<compile_context>
chip_gen: v7x
topology: tpu7x:2x2x1
jax: 0.10.0
libtpu: 0.0.40
codegen_flags: <defaults>
</compile_context>

<pallas_src>
import functools

import jax
import jax.numpy as jnp
from jax.experimental import pallas as pl
from jax.experimental.pallas import tpu as pltpu


def _round_up(n, m):
    return ((n + m - 1) // m) * m


def _node_block_kernel(x_ref, w1_ref, b1_ref, thr_ref, weff_ref, c_ref,
                       out_ref, *, depth, mxu_dtype, approx_sigmoid):
    # scores = x @ W1 + b1                               -> (TB, T_pad), f32 acc
    scores = jnp.dot(x_ref[...].astype(mxu_dtype),
                     w1_ref[...].astype(mxu_dtype),
                     preferred_element_type=jnp.float32) + b1_ref[...]

    # p = prod_d sigmoid(scores - thr_d)                 -> (TB, T_pad), f32
    # depth is a small static constant -> Python unroll (VPU/EUP work).
    prod = jnp.ones_like(scores)
    for d in range(depth):
        z = scores - thr_ref[d:d + 1, :]
        denom = 1.0 + jnp.exp(-z)
        if approx_sigmoid:
            sig = pl.reciprocal(denom, approx=True)   # EUP slot, no VALU divide
        else:
            sig = 1.0 / denom
        prod = prod * sig

    # Folded leaf matmul: out = p @ W_eff + c            -> (TB, H_pad)
    out = jnp.dot(prod.astype(mxu_dtype), weff_ref[...].astype(mxu_dtype),
                  preferred_element_type=jnp.float32) + c_ref[...]
    out_ref[...] = out.astype(out_ref.dtype)


def node_block_forward(x, w1, b1, thresholds, w2, b2, *, depth,
                       block_b=256, mxu_dtype=jnp.bfloat16,
                       approx_sigmoid=True):
    """NODEBlock forward.

    x:          (B, input_dim)
    w1, b1:     feature_selection Linear as (input_dim, num_trees), (num_trees,)
    thresholds: (num_trees, depth)
    w2, b2:     leaf_weights Linear as (num_leaves, hidden_dim), (hidden_dim,)
    returns     (B, hidden_dim) float32
    """
    B, input_dim = x.shape
    num_trees = w1.shape[1]
    hidden_dim = w2.shape[1]
    rep = 2 ** (depth - 1)
    assert w2.shape[0] == num_trees * (2 ** depth)
    assert thresholds.shape == (num_trees, depth)

    # ---- Fold the leaf replication into W2 (host side, f32) ----------------
    # leaves = tile([p, 1-p], rep)  =>  out = p @ (W2a - W2b) + (1.W2b + b2)
    w2_fold = jnp.sum(w2.astype(jnp.float32).reshape(rep, 2 * num_trees,
                                                     hidden_dim), axis=0)
    w2a, w2b = w2_fold[:num_trees], w2_fold[num_trees:]
    w_eff = w2a - w2b                                         # (T, H)
    c = jnp.sum(w2b, axis=0) + b2.astype(jnp.float32)         # (H,)

    # ---- Pad lane dims to multiples of 128; batch to the tile ---------------
    d_pad = _round_up(input_dim, 128)
    t_pad = _round_up(num_trees, 128)
    h_pad = _round_up(hidden_dim, 128)
    block_b = max(16, _round_up(block_b, 16))
    tb = min(block_b, _round_up(B, 16))
    b_pad = _round_up(B, tb)

    xp = jnp.pad(x.astype(jnp.float32),
                 ((0, b_pad - B), (0, d_pad - input_dim)))
    w1p = jnp.pad(w1.astype(jnp.float32),
                  ((0, d_pad - input_dim), (0, t_pad - num_trees)))
    b1p = jnp.pad(b1.astype(jnp.float32),
                  (0, t_pad - num_trees)).reshape(1, t_pad)
    thrp = jnp.pad(thresholds.T.astype(jnp.float32),
                   ((0, 0), (0, t_pad - num_trees)))          # (depth, T_pad)
    weffp = jnp.pad(w_eff, ((0, t_pad - num_trees), (0, h_pad - hidden_dim)))
    cp = jnp.pad(c, (0, h_pad - hidden_dim)).reshape(1, h_pad)

    grid = (b_pad // tb,)
    kernel = functools.partial(_node_block_kernel, depth=depth,
                               mxu_dtype=mxu_dtype,
                               approx_sigmoid=approx_sigmoid)

    # VMEM budget: resident weights (double-buffered alloc) + 2 x/out tiles.
    f32b = 4
    weight_bytes = f32b * (d_pad * t_pad + t_pad + depth * t_pad
                           + t_pad * h_pad + h_pad)
    tile_bytes = f32b * tb * (d_pad + h_pad)
    vmem_limit = int(min(max(2 * weight_bytes + 2 * tile_bytes + (4 << 20),
                             32 << 20), 64 << 20))

    cost = pl.CostEstimate(
        flops=2 * b_pad * d_pad * t_pad + 2 * b_pad * t_pad * h_pad,
        transcendentals=b_pad * t_pad * depth,
        bytes_accessed=f32b * (b_pad * d_pad + d_pad * t_pad + b_pad * h_pad
                               + t_pad * h_pad + (depth + 1) * t_pad + h_pad),
    )

    out_padded = pl.pallas_call(
        kernel,
        out_shape=jax.ShapeDtypeStruct((b_pad, h_pad), jnp.float32),
        grid_spec=pltpu.PrefetchScalarGridSpec(
            num_scalar_prefetch=0,
            grid=grid,
            in_specs=[
                pl.BlockSpec((tb, d_pad), lambda i: (i, 0)),       # x tile
                pl.BlockSpec((d_pad, t_pad), lambda i: (0, 0)),    # W1 (resident)
                pl.BlockSpec((1, t_pad), lambda i: (0, 0)),        # b1
                pl.BlockSpec((depth, t_pad), lambda i: (0, 0)),    # thresholds
                pl.BlockSpec((t_pad, h_pad), lambda i: (0, 0)),    # folded W2
                pl.BlockSpec((1, h_pad), lambda i: (0, 0)),        # folded bias
            ],
            out_specs=pl.BlockSpec((tb, h_pad), lambda i: (i, 0)),
        ),
        compiler_params=pltpu.CompilerParams(
            dimension_semantics=("parallel",),
            vmem_limit_bytes=vmem_limit,
        ),
        cost_estimate=cost,
    )(xp, w1p, b1p, thrp, weffp, cp)

    return out_padded[:B, :hidden_dim]


def node_block_reference(x, w1, b1, thresholds, w2, b2, *, depth):
    scores = x @ w1 + b1                                     # (B, T)
    dec = jax.nn.sigmoid(scores[:, :, None] - thresholds[None, :, :])
    leaves = jnp.prod(dec, axis=-1)                          # (B, T)
    leaves = jnp.concatenate([leaves, 1.0 - leaves], axis=-1)
    leaves = jnp.tile(leaves, (1, 2 ** (depth - 1)))         # (B, T*2**depth)
    return leaves @ w2 + b2


if __name__ == "__main__":
    # Small, deterministic configuration (deliberately non-aligned shapes to
    # exercise the padding path; block_b=16 below exercises a multi-step grid).
    B, input_dim, hidden_dim, num_trees, depth = 40, 20, 24, 10, 3
    num_leaves = num_trees * 2 ** depth

    key = jax.random.PRNGKey(0)
    kx, kw1, kb1, kth, kw2, kb2 = jax.random.split(key, 6)

    x = jax.random.normal(kx, (B, input_dim), dtype=jnp.float32)
    w1 = jax.random.normal(kw1, (input_dim, num_trees), dtype=jnp.float32) * 0.1
    b1 = jax.random.normal(kb1, (num_trees,), dtype=jnp.float32) * 0.1
    thresholds = jax.random.normal(kth, (num_trees, depth), dtype=jnp.float32)
    w2 = jax.random.normal(kw2, (num_leaves, hidden_dim), dtype=jnp.float32) * 0.1
    b2 = jax.random.normal(kb2, (hidden_dim,), dtype=jnp.float32) * 0.1

    ref = node_block_reference(x, w1, b1, thresholds, w2, b2, depth=depth)

    # 1) Validate the algebraic W2 fold with f32 MXU operands + exact sigmoid,
    #    small batch tile so the batch grid has multiple pipelined steps.
    out_f32 = node_block_forward(x, w1, b1, thresholds, w2, b2, depth=depth,
                                 block_b=16, mxu_dtype=jnp.float32,
                                 approx_sigmoid=False)
    out_f32 = jax.block_until_ready(out_f32)
    assert out_f32.shape == (B, hidden_dim)
    assert jnp.allclose(out_f32, ref, atol=5e-3, rtol=5e-3), (
        float(jnp.max(jnp.abs(out_f32 - ref))))

    # 2) Default fast path: bf16 MXU operands + EUP approx-reciprocal sigmoid.
    out_fast = node_block_forward(x, w1, b1, thresholds, w2, b2, depth=depth)
    out_fast = jax.block_until_ready(out_fast)
    assert out_fast.shape == (B, hidden_dim)
    assert jnp.allclose(out_fast, ref, atol=3e-2, rtol=3e-2), (
        float(jnp.max(jnp.abs(out_fast - ref))))

    print("KERNEL_OK")
</pallas_src>

<mosaic_0001>
module attributes {stable_mosaic.version = 11 : i64} {
  func.func @_node_block_kernel(%arg0: i32, %arg1: memref<16x128xf32, #tpu.memory_space<vmem>>, %arg2: memref<128x128xf32, #tpu.memory_space<vmem>>, %arg3: memref<1x128xf32, #tpu.memory_space<vmem>>, %arg4: memref<3x128xf32, #tpu.memory_space<vmem>>, %arg5: memref<128x128xf32, #tpu.memory_space<vmem>>, %arg6: memref<1x128xf32, #tpu.memory_space<vmem>>, %arg7: memref<16x128xf32, #tpu.memory_space<vmem>>) attributes {dimension_semantics = [#tpu.dimension_semantics<parallel>], iteration_bounds = array<i64: 3>, scalar_prefetch = 0 : i64, scratch_operands = 0 : i64, tpu.core_type = #tpu.core_type<tc>, window_params = [{transform_indices = @transform_0, window_bounds = array<i64: 16, 128>}, {pipeline_mode = #tpu.pipeline_mode<synchronous>, transform_indices = @transform_1, window_bounds = array<i64: 128, 128>}, {pipeline_mode = #tpu.pipeline_mode<synchronous>, transform_indices = @transform_2, window_bounds = array<i64: 1, 128>}, {pipeline_mode = #tpu.pipeline_mode<synchronous>, transform_indices = @transform_3, window_bounds = array<i64: 3, 128>}, {pipeline_mode = #tpu.pipeline_mode<synchronous>, transform_indices = @transform_4, window_bounds = array<i64: 128, 128>}, {pipeline_mode = #tpu.pipeline_mode<synchronous>, transform_indices = @transform_5, window_bounds = array<i64: 1, 128>}, {transform_indices = @transform_6, window_bounds = array<i64: 16, 128>}]} {
    %c0 = arith.constant 0 : index
    %c0_0 = arith.constant 0 : index
    %0 = vector.load %arg1[%c0, %c0_0] : memref<16x128xf32, #tpu.memory_space<vmem>>, vector<16x128xf32>
    %c0_1 = arith.constant 0 : index
    %c0_2 = arith.constant 0 : index
    %1 = vector.load %arg2[%c0_1, %c0_2] : memref<128x128xf32, #tpu.memory_space<vmem>>, vector<128x128xf32>
    %cst = arith.constant dense<0.000000e+00> : vector<16x128xf32>
    %2 = tpu.matmul %0, %1, %cst {dimension_numbers = #tpu.dot_dimension_numbers<[1], [0], [0], [1], [0, 0, 1, 1], [], []>} : vector<16x128xf32>, vector<128x128xf32>, vector<16x128xf32> -> vector<16x128xf32>
    %c0_3 = arith.constant 0 : index
    %c0_4 = arith.constant 0 : index
    %3 = vector.load %arg3[%c0_3, %c0_4] : memref<1x128xf32, #tpu.memory_space<vmem>>, vector<1x128xf32>
    %4 = vector.broadcast %3 : vector<1x128xf32> to vector<16x128xf32>
    %5 = arith.addf %2, %4 : vector<16x128xf32>
    %cst_5 = arith.constant 1.000000e+00 : f32
    %6 = vector.broadcast %cst_5 : f32 to vector<16x128xf32>
    %c0_6 = arith.constant 0 : index
    %c0_7 = arith.constant 0 : index
    %7 = vector.load %arg4[%c0_6, %c0_7] : memref<3x128xf32, #tpu.memory_space<vmem>>, vector<1x128xf32>
    %8 = vector.broadcast %7 : vector<1x128xf32> to vector<16x128xf32>
    %9 = arith.subf %5, %8 : vector<16x128xf32>
    %cst_8 = arith.constant 0.000000e+00 : f32
    %10 = vector.broadcast %cst_8 : f32 to vector<16x128xf32>
    %11 = arith.subf %10, %9 : vector<16x128xf32>
    %12 = math.exp %11 : vector<16x128xf32>
    %cst_9 = arith.constant 1.000000e+00 : f32
    %13 = vector.broadcast %cst_9 : f32 to vector<16x128xf32>
    %14 = arith.addf %13, %12 : vector<16x128xf32>
    %cst_10 = arith.constant 1.000000e+00 : f32
    %15 = vector.broadcast %cst_10 : f32 to vector<16x128xf32>
    %16 = arith.divf %15, %14 : vector<16x128xf32>
    %17 = arith.mulf %6, %16 : vector<16x128xf32>
    %c1 = arith.constant 1 : index
    %c0_11 = arith.constant 0 : index
    %18 = vector.load %arg4[%c1, %c0_11] : memref<3x128xf32, #tpu.memory_space<vmem>>, vector<1x128xf32>
    %19 = vector.broadcast %18 : vector<1x128xf32> to vector<16x128xf32>
    %20 = arith.subf %5, %19 : vector<16x128xf32>
    %cst_12 = arith.constant 0.000000e+00 : f32
    %21 = vector.broadcast %cst_12 : f32 to vector<16x128xf32>
    %22 = arith.subf %21, %20 : vector<16x128xf32>
    %23 = math.exp %22 : vector<16x128xf32>
    %cst_13 = arith.constant 1.000000e+00 : f32
    %24 = vector.broadcast %cst_13 : f32 to vector<16x128xf32>
    %25 = arith.addf %24, %23 : vector<16x128xf32>
    %cst_14 = arith.constant 1.000000e+00 : f32
    %26 = vector.broadcast %cst_14 : f32 to vector<16x128xf32>
    %27 = arith.divf %26, %25 : vector<16x128xf32>
    %28 = arith.mulf %17, %27 : vector<16x128xf32>
    %c2 = arith.constant 2 : index
    %c0_15 = arith.constant 0 : index
    %29 = vector.load %arg4[%c2, %c0_15] : memref<3x128xf32, #tpu.memory_space<vmem>>, vector<1x128xf32>
    %30 = vector.broadcast %29 : vector<1x128xf32> to vector<16x128xf32>
    %31 = arith.subf %5, %30 : vector<16x128xf32>
    %cst_16 = arith.constant 0.000000e+00 : f32
    %32 = vector.broadcast %cst_16 : f32 to vector<16x128xf32>
    %33 = arith.subf %32, %31 : vector<16x128xf32>
    %34 = math.exp %33 : vector<16x128xf32>
    %cst_17 = arith.constant 1.000000e+00 : f32
    %35 = vector.broadcast %cst_17 : f32 to vector<16x128xf32>
    %36 = arith.addf %35, %34 : vector<16x128xf32>
    %cst_18 = arith.constant 1.000000e+00 : f32
    %37 = vector.broadcast %cst_18 : f32 to vector<16x128xf32>
    %38 = arith.divf %37, %36 : vector<16x128xf32>
    %39 = arith.mulf %28, %38 : vector<16x128xf32>
    %c0_19 = arith.constant 0 : index
    %c0_20 = arith.constant 0 : index
    %40 = vector.load %arg5[%c0_19, %c0_20] : memref<128x128xf32, #tpu.memory_space<vmem>>, vector<128x128xf32>
    %cst_21 = arith.constant dense<0.000000e+00> : vector<16x128xf32>
    %41 = tpu.matmul %39, %40, %cst_21 {dimension_numbers = #tpu.dot_dimension_numbers<[1], [0], [0], [1], [0, 0, 1, 1], [], []>} : vector<16x128xf32>, vector<128x128xf32>, vector<16x128xf32> -> vector<16x128xf32>
    %c0_22 = arith.constant 0 : index
    %c0_23 = arith.constant 0 : index
    %42 = vector.load %arg6[%c0_22, %c0_23] : memref<1x128xf32, #tpu.memory_space<vmem>>, vector<1x128xf32>
    %43 = vector.broadcast %42 : vector<1x128xf32> to vector<16x128xf32>
    %44 = arith.addf %41, %43 : vector<16x128xf32>
    %c0_24 = arith.constant 0 : index
    %c0_25 = arith.constant 0 : index
    %45 = vector.load %arg7[%c0_24, %c0_25] : memref<16x128xf32, #tpu.memory_space<vmem>>, vector<16x128xf32>
    tpu.vector_store %arg7[%c0_24, %c0_25], %44 {strides = array<i32>} : memref<16x128xf32, #tpu.memory_space<vmem>>, vector<16x128xf32>,
    return
  }
  func.func @transform_0(%arg0: i32) -> (i32, i32) {
    %c0_i32 = arith.constant 0 : i32
    %c0_i32_0 = arith.constant 0 : i32
    return %arg0, %c0_i32 : i32, i32
  }
  func.func @transform_1(%arg0: i32) -> (i32, i32) {
    %c0_i32 = arith.constant 0 : i32
    %c0_i32_0 = arith.constant 0 : i32
    %c0_i32_1 = arith.constant 0 : i32
    return %c0_i32, %c0_i32_0 : i32, i32
  }
  func.func @transform_2(%arg0: i32) -> (i32, i32) {
    %c0_i32 = arith.constant 0 : i32
    %c0_i32_0 = arith.constant 0 : i32
    %c0_i32_1 = arith.constant 0 : i32
    return %c0_i32, %c0_i32_0 : i32, i32
  }
  func.func @transform_3(%arg0: i32) -> (i32, i32) {
    %c0_i32 = arith.constant 0 : i32
    %c0_i32_0 = arith.constant 0 : i32
    %c0_i32_1 = arith.constant 0 : i32
    return %c0_i32, %c0_i32_0 : i32, i32
  }
  func.func @transform_4(%arg0: i32) -> (i32, i32) {
    %c0_i32 = arith.constant 0 : i32
    %c0_i32_0 = arith.constant 0 : i32
    %c0_i32_1 = arith.constant 0 : i32
    return %c0_i32, %c0_i32_0 : i32, i32
  }
  func.func @transform_5(%arg0: i32) -> (i32, i32) {
    %c0_i32 = arith.constant 0 : i32
    %c0_i32_0 = arith.constant 0 : i32
    %c0_i32_1 = arith.constant 0 : i32
    return %c0_i32, %c0_i32_0 : i32, i32
  }
  func.func @transform_6(%arg0: i32) -> (i32, i32) {
    %c0_i32 = arith.constant 0 : i32
    %c0_i32_0 = arith.constant 0 : i32
    return %arg0, %c0_i32 : i32, i32
  }
}

</mosaic_0001>

<bundles_post_ra>
// kernel: tpu_custom_call.1
= control target key start
LH: loop header
LB: loop body
LE: loop exit
PB: predicated region body
PF: predicated region fallthrough
CT: control target
= control target key end

     0   :  { %11 = vsyncpa [#allocation3], 0  ;;  %s1416_s0 = inlined_call_operand.hbm [shape: f32[48,128], index: 0, kind: input, shape index: {}]   ;;  %s1417_s1 = inlined_call_operand.hbm [shape: f32[128,128], index: 1, kind: input, shape index: {}]   ;;  %s1418_s2 = inlined_call_operand.vmem [shape: f32[1,128], index: 2, kind: input, shape index: {}]   ;;  %s1419_s3 = inlined_call_operand.vmem [shape: f32[3,128], index: 3, kind: input, shape index: {}]   ;;  %s1420_s4 = inlined_call_operand.hbm [shape: f32[128,128], index: 4, kind: input, shape index: {}]   ;;  %s1421_s5 = inlined_call_operand.vmem [shape: f32[1,128], index: 5, kind: input, shape index: {}]   ;;  %s1422_s6 = inlined_call_operand.hbm [shape: f32[48,128], index: 6, kind: output, shape index: {}]  }
   0x1   :  { %13 = vsyncpa [#allocation3 + $0x1], 0 }
   0x2   :  { %14 = vsyncpa [#allocation6], 0 }
   0x3   :  { %15 = vsyncpa [#allocation4], 0 }
   0x4   :  { %17 = vsyncpa [#allocation4 + $0x1], 0  ;;  %s1159_s21 = smov 0   ;;  %s1161_s22 = smov 0  }
   0x5   :  { %s1163_s23 = smov 0   ;;  %s1165_s24 = smov 0  }
   0x6 LB: > { %s1180_s25 = sadd.s32 4294967295, %s1114_s24   ;;  %s668_s26 = sadd.s32 4294967294, %s1114_s24   ;;  %s1114_s24 = sphi %s1165_s24, %s1441_s24   ;;  %s1110_s23 = sphi %s1163_s23, %s1440_s23   ;;  %s1106_s22 = sphi %s1161_s22, %s1439_s22   ;;  %s1102_s21 = sphi %s1159_s21, %s1438_s21  }
   0x7   : > { %p43_p0 = scmp.ne.s32.totalorder %s1106_s22, %s1102_s21  ;;  %p1423_p1 = scmp.eq.s32.totalorder %s1180_s25, 0 }
   0x8   : > { %p178_p3 = scmp.eq.s32.totalorder %s668_s26, 2  ;;  %p669_p5 = scmp.ge.s32.totalorder %s1114_s24, 1 }
   0x9   : > { %p1189_p4 = por %p1423_p1, %p43_p0  ;;  %p185_p7 = scmp.lt.s32.totalorder %s1114_s24, 4 }
   0xa   : > { %p1194_p6 = por %p178_p3, %p43_p0  ;;  %s1116_s30 = smov [#allocation5]  }
   0xb   : > { %s1426_s27 = scalar_select %p1189_p4, 1, 0 }
   0xc   : > { %s1427_s28 = scalar_select %p1194_p6, 1, 0 }
   0xd   : > { %p1199_p8 = pnand %p669_p5, %p185_p7  ;;  %s197_s7 = sshll.u32 %s1116_s30, 4  ;;  %s198_s7 = int_to_ptr.vmem [resolvable:$true] %s197_s7 }
   0xe   : > { %s1117_s9 = smov [#allocation7]   ;;  %s958_s13 = scalar_lea.hbm %s1417_s1, 2048 }
   0xf   : > { %s1428_s29 = scalar_select %p1199_p8, 1, 0 }
  0x10   : > { %p875_p9 = pneg %p1199_p8  ;;  %s216_s10 = sshll.u32 %s1117_s9, 4  ;;  %s1211_s10 = int_to_ptr.vmem [resolvable:$true] %s216_s10 }
  0x11   : > { %p959_p11 = scmp.ne.s32.totalorder %s1417_s1, %s958_s13  ;;  %p965_p3 = scmp.lt.u32.totalorder %s958_s13, %s1417_s1 }
  0x12   : > { %p1207_p10 = pnand %p875_p9, %p1423_p1 }
  0x14   : > { %p960_p12 = pneg %p1207_p10 }
  0x16   : > { %p961_p13 = pnand %p960_p12, %p959_p11 }
  0x18   : > { %p962_p0 = pneg %p961_p13 }
  0x1a   : > { %p967_p5 = pnand %p965_p3, %p962_p0 }
  0x1c   : > { %970 = shalt.err (!%p967_p5)
}
  0x1d   : > { %s971_s18 = scalar_lea.vmem %s198_s7, 2048  ;;  %p979_p2 = scmp.lt.s32.totalorder %s198_s7, %s198_s7 }
  0x1e   : > { %p972_p7 = scmp.ne.s32.totalorder %s198_s7, %s971_s18  ;;  %p980_p6 = scmp.lt.s32.totalorder %s971_s18, %s971_s18 }
  0x20   : > { %p974_p9 = pnand %p972_p7, %p960_p12  ;;  %p981_p4 = por %p980_p6, %p979_p2 }
  0x22   : > { %p975_p1 = pneg %p974_p9 }
  0x24   : > { %p982_p8 = pnand %p981_p4, %p975_p1 }
  0x26   : > { %985 = shalt.err (!%p982_p8)
}
  0x27   : > { %s1118_s19 = smov 128   ;;  %s1119_s20 = smov 8  }
  0x28   : > { %878 = dma.hbm_to_vmem [thread:$0]  (!%p1207_p10), %s1417_s1, 2048, %s198_s7, [#allocation6], %s1118_s19, %s1118_s19, %s1119_s20  }
  0x29   : > { %s986_s12 = scalar_lea.hbm %s1420_s4, 2048 }
  0x2a   : > { %p987_p1 = scmp.ne.s32.totalorder %s1420_s4, %s986_s12  ;;  %p993_p6 = scmp.lt.u32.totalorder %s986_s12, %s1420_s4 }
  0x2c   : > { %p989_p2 = pnand %p987_p1, %p960_p12 }
  0x2e   : > { %p990_p4 = pneg %p989_p2 }
  0x30   : > { %p995_p8 = pnand %p993_p6, %p990_p4 }
  0x32   : > { %998 = shalt.err (!%p995_p8)
}
  0x33   : > { %s999_s7 = scalar_lea.vmem %s1211_s10, 2048  ;;  %p1007_p3 = scmp.lt.s32.totalorder %s1211_s10, %s1211_s10 }
  0x34   : > { %p1000_p11 = scmp.ne.s32.totalorder %s1211_s10, %s999_s7  ;;  %p1008_p5 = scmp.lt.s32.totalorder %s999_s7, %s999_s7 }
  0x36   : > { %p1002_p13 = pnand %p1000_p11, %p960_p12  ;;  %p1009_p7 = por %p1008_p5, %p1007_p3 }
  0x38   : > { %p1003_p0 = pneg %p1002_p13 }
  0x3a   : > { %p1010_p9 = pnand %p1009_p7, %p1003_p0 }
  0x3c   : > { %1013 = shalt.err (!%p1010_p9)
}
  0x3d   : > { %881 = dma.hbm_to_vmem [thread:$0]  (!%p1207_p10), %s1420_s4, 2048, %s1211_s10, [#allocation6], %s1118_s19, %s1118_s19, %s1119_s20  }
  0x3e   : > { %s1267_s8 = sadd.s32 1, %s1114_s24   ;;  %s30_s26 = sadd.s32 1, %s1110_s23 }
  0x3f   : > { %s27_s30 = ssub.s32 %s1114_s24, %s1267_s8  ;;  %p37_p12 = scmp.ne.s32.totalorder %s1110_s23, %s1106_s22 }
  0x40   : > { %p28_p1 = scmp.eq.s32.totalorder %s27_s30, 0  ;;  %p38_p2 = scmp.eq.s32.totalorder %s1114_s24, 0 }
  0x41   : > { %p1430_p4 = scmp.eq.s32.totalorder %s1180_s25, 2  ;;  %p892_p8 = scmp.lt.s32.totalorder %s1114_s24, 3 }
  0x42   : > { %s1283_s11 = scalar_select %p28_p1, %s1110_s23, %s30_s26  }
  0x43   : > { %p1277_p6 = por %p1430_p4, %p37_p12  ;;  %p39_p11 = por %p38_p2, %p37_p12 }
  0x44   : > { %s233_s12 = sand.u32 1, %s1110_s23   ;;  %s691_s10 = sshll.u32 %s1114_s24, 8 }
  0x45   : > { %s673_s13 = sshll.u32 %s233_s12, 4  ;;  %s1290_s16 = scalar_lea.hbm %s1416_s0, %s691_s10 }
  0x46   : > { %s237_s7 = scalar_lea.vmem [#allocation2], %s673_s13  ;;  %p1294_p10 = pnand %p892_p8, %p39_p11 }
  0x47   : > { %s244_s17 = sshll.u32 %s237_s7, 4  ;;  %s1298_s26 = scalar_lea.sflag [#allocation3], %s233_s12  ;;  %s1292_s17 = int_to_ptr.vmem [resolvable:$true] %s244_s17 }
  0x48   : > { %s1014_s30 = scalar_lea.hbm %s1290_s16, 256  ;;  %p1016_p0 = pneg %p1294_p10 }
  0x49   : > { %p1015_p13 = scmp.ne.s32.totalorder %s1290_s16, %s1014_s30  ;;  %s1019_s14 = scalar_lea.hbm %s1416_s0, 768 }
  0x4a   : > { %p1020_p7 = scmp.lt.u32.totalorder %s1290_s16, %s1416_s0  ;;  %p1021_p9 = scmp.lt.u32.totalorder %s1019_s14, %s1014_s30 }
  0x4b   : > { %p1017_p3 = pnand %p1016_p0, %p1015_p13  ;;  %p1023_p1 = scmp.lt.u32.totalorder %s1014_s30, %s1290_s16 }
  0x4c   : > { %p1022_p12 = por %p1021_p9, %p1020_p7 }
  0x4d   : > { %p1018_p5 = pneg %p1017_p3 }
  0x4e   : > { %p1024_p2 = por %p1023_p1, %p1022_p12 }
  0x50   : > { %p1025_p4 = pnand %p1024_p2, %p1018_p5 }
  0x52   : > { %1028 = shalt.err (!%p1025_p4)
}
  0x53   : > { %s1029_s12 = scalar_lea.vmem %s1292_s17, 256  ;;  %s1120_s13 = smov [#allocation2]  }
  0x54   : > { %p1030_p8 = scmp.ne.s32.totalorder %s1292_s17, %s1029_s12  ;;  %s1034_s10 = sshll.u32 %s1120_s13, 4  ;;  %s1035_s10 = int_to_ptr.vmem [resolvable:$false] %s1034_s10 }
  0x55   : > { %s1036_s15 = scalar_lea.vmem %s1035_s10, 512  ;;  %p1037_p3 = scmp.lt.s32.totalorder %s1292_s17, %s1035_s10 }
  0x56   : > { %p1032_p11 = pnand %p1030_p8, %p1016_p0  ;;  %p1038_p7 = scmp.lt.s32.totalorder %s1036_s15, %s1029_s12 }
  0x58   : > { %p1033_p13 = pneg %p1032_p11  ;;  %p1039_p9 = por %p1038_p7, %p1037_p3 }
  0x5a   : > { %p1040_p12 = pnand %p1039_p9, %p1033_p13 }
  0x5c   : > { %1043 = shalt.err (!%p1040_p12)
}
  0x5d   : > { %885 = dma.hbm_to_vmem [thread:$0]  (!%p1294_p10), %s1290_s16, 256, %s1292_s17, %s1298_s26, %s1118_s19, %s1118_s19, %s1119_s20  }
  0x5e   : > { %p1433_p0 = scmp.ne.s32.totalorder %s1428_s29, 0 }
  0x5f   : > { %s1332_s30 = sand.u32 (!%p1433_p0), 1, %s1106_s22   ;;  %p1434_p5 = scmp.ne.s32.totalorder (!%p1433_p0), %s1426_s27, 0 }
  0x60   : > { %256 = sbr.rel (%p1433_p0) target bundleno = 625 (0x271), region = 44  ;;  %s677_s14 = sshll.u32 (!%p1433_p0), %s1332_s30, 4 }
  0x61   : > { %s259_s7 = scalar_lea.sflag (!%p1433_p0), [#allocation3], %s1332_s30  ;;  %s1338_s18 = scalar_lea.vmem (!%p1433_p0), [#allocation2], %s677_s14 }
  0x67   : > { %1089 = dma.done.wait (%p1434_p5), %s259_s7, 256  }
  0x68   : > { %1091 = vsyncadd (%p1434_p5), %s259_s7, 4294967040  ;;  %p1435_p10 = scmp.eq.s32.totalorder %s1180_s25, 0 }
  0x6a   : > { %1093 = dma.done.wait (%p1435_p10), [#allocation6], 4096   ;;  %p1436_p1 = pmov %p1435_p10 }
  0x6b   : > { %v303_v0 = vld [vmem:[#allocation5] sm:$0xff]  ;;  %v304_v1 = vld [vmem:[#allocation5 + $0x8] sm:$0xff]  ;;  %v305_v2 = vld [vmem:[#allocation5 + $0x10] sm:$0xff]  ;;  %s298_s13 = scalar_lea.vmem [#allocation8], %s677_s14  ;;  %s563_s14 = scalar_lea.sflag [#allocation4], %s1332_s30 }
  0x6c   : > { %1095 = vsyncadd (%p1436_p1), [#allocation6], 4294963200  ;;  %v799_v3 = vpack.c.bf16 %v304_v1, %v303_v0  ;;  %v306_v4 = vld [vmem:[#allocation5 + $0x18] sm:$0xff]  ;;  %v307_v6 = vld [vmem:[#allocation5 + $0x20] sm:$0xff]  ;;  %s576_s10 = sshll.u32 %s298_s13, 4  ;;  %s1368_s10 = int_to_ptr.vmem [resolvable:$true] %s576_s10 }
  0x6d   : > { %v803_v5 = vpack.c.bf16 %v306_v4, %v305_v2  ;;  %v308_v7 = vld [vmem:[#allocation5 + $0x28] sm:$0xff]  ;;  %v301_v9 = vld [vmem:[%s1338_s18] sm:$0xff]  ;;  %v310_v11 = vld [vmem:[#allocation5 + $0x38] sm:$0xff]  ;;  %s1044_s20 = scalar_lea.vmem %s1368_s10, 256 }
  0x6e   : > { %800 = vmatprep.subr.bf16.mxu0 %v799_v3  ;;  %v807_v8 = vpack.c.bf16 %v308_v7, %v307_v6  ;;  %v309_v10 = vld [vmem:[#allocation5 + $0x30] sm:$0xff]  ;;  %761 = vmatprep.mubr.f32.mxu0 %v301_v9  ;;  %v311_v13 = vld [vmem:[#allocation5 + $0x40] sm:$0xff]  ;;  %v312_v14 = vld [vmem:[#allocation5 + $0x48] sm:$0xff]  ;;  %p1045_p2 = scmp.ne.s32.totalorder %s1368_s10, %s1044_s20 }
  0x6f   : > { %802 = vmatpush3.bf16.msra.mxu0 %v799_v3  ;;  %v811_v12 = vpack.c.bf16 %v310_v11, %v309_v10  ;;  %v815_v15 = vpack.c.bf16 %v312_v14, %v311_v13  ;;  %v313_v16 = vld [vmem:[#allocation5 + $0x50] sm:$0xff]  ;;  %v314_v17 = vld [vmem:[#allocation5 + $0x58] sm:$0xff]  ;;  %v315_v19 = vld [vmem:[#allocation5 + $0x60] sm:$0xff] }
  0x70   : > { %804 = vmatprep.subr.bf16.mxu0 %v803_v5  ;;  %v819_v18 = vpack.c.bf16 %v314_v17, %v313_v16  ;;  %v316_v20 = vld [vmem:[#allocation5 + $0x68] sm:$0xff]  ;;  %v317_v22 = vld [vmem:[#allocation5 + $0x70] sm:$0xff]  ;;  %v318_v23 = vld [vmem:[#allocation5 + $0x78] sm:$0xff]  ;;  %p1046_p4 = pnand %p1045_p2, %p1277_p6 }
  0x71   : > { %v823_v21 = vpack.c.bf16 %v316_v20, %v315_v19  ;;  %v827_v24 = vpack.c.bf16 %v318_v23, %v317_v22  ;;  %v302_v25 = vld [vmem:[%s1338_s18 + $0x8] sm:$0xff]  ;;  %v462_v26 = vld [vmem:[#allocation7] sm:$0xff]  ;;  %v464_v29 = vld [vmem:[#allocation7 + $0x10] sm:$0xff]  ;;  %s692_s18 = sshll.u32 %s1180_s25, 8  ;;  %s1121_s25 = smov [#allocation8]  }
  0x72   : > { %v463_v27 = vld [vmem:[#allocation7 + $0x8] sm:$0xff]  ;;  %v465_v30 = vld [vmem:[#allocation7 + $0x18] sm:$0xff]  ;;  %v466_v32 = vld [vmem:[#allocation7 + $0x20] sm:$0xff]  ;;  %s1373_s19 = scalar_lea.hbm %s1422_s6, %s692_s18  ;;  %p1047_p8 = pneg %p1046_p4 }
  0x73   : > { %806 = vmatpush3.bf16.msra.mxu0 %v803_v5  ;;  %v831_v28 = vpack.c.bf16 %v463_v27, %v462_v26  ;;  %v835_v31 = vpack.c.bf16 %v465_v30, %v464_v29  ;;  %v467_v33 = vld [vmem:[#allocation7 + $0x28] sm:$0xff]  ;;  %v468_v35 = vld [vmem:[#allocation7 + $0x30] sm:$0xff]  ;;  %v469_v36 = vld [vmem:[#allocation7 + $0x38] sm:$0xff]  ;;  %s1048_s16 = sshll.u32 %s1121_s25, 4  ;;  %s1049_s16 = int_to_ptr.vmem [resolvable:$false] %s1048_s16 }
  0x74   : > { %808 = vmatprep.subr.bf16.mxu0 %v807_v8  ;;  %v839_v34 = vpack.c.bf16 %v467_v33, %v466_v32  ;;  %v843_v37 = vpack.c.bf16 %v469_v36, %v468_v35  ;;  %v470_v38 = vld [vmem:[#allocation7 + $0x40] sm:$0xff]  ;;  %v471_v39 = vld [vmem:[#allocation7 + $0x48] sm:$0xff]  ;;  %v472_v41 = vld [vmem:[#allocation7 + $0x50] sm:$0xff]  ;;  %s1050_s17 = scalar_lea.vmem %s1049_s16, 512  ;;  %p1051_p11 = scmp.lt.s32.totalorder %s1368_s10, %s1049_s16 }
  0x75   : > { %832 = vmatprep.subr.bf16.mxu1 %v831_v28  ;;  %v847_v40 = vpack.c.bf16 %v471_v39, %v470_v38  ;;  %v473_v42 = vld [vmem:[#allocation7 + $0x58] sm:$0xff]  ;;  %v474_v43 = vld [vmem:[#allocation7 + $0x60] sm:$0xff]  ;;  %v475_v45 = vld [vmem:[#allocation7 + $0x68] sm:$0xff]  ;;  %p1052_p13 = scmp.lt.s32.totalorder %s1050_s17, %s1044_s20 }
  0x76   : > { %834 = vmatpush3.bf16.msra.mxu1 %v831_v28  ;;  %v851_v44 = vpack.c.bf16 %v473_v42, %v472_v41  ;;  %v855_v46 = vpack.c.bf16 %v475_v45, %v474_v43  ;;  %v476_v47 = vld [vmem:[#allocation7 + $0x70] sm:$0xff]  ;;  %v477_v48 = vld [vmem:[#allocation7 + $0x78] sm:$0xff]  ;;  %v681_v50 = vld [vmem:[%s1418_s2] ss:$0 sm:$0xff] }
  0x77   : > { %810 = vmatpush3.bf16.msra.mxu0 %v807_v8  ;;  %836 = vmatprep.subr.bf16.mxu1 %v835_v31  ;;  %v859_v49 = vpack.c.bf16 %v477_v48, %v476_v47  ;;  %v682_v51 = vld [vmem:[%s1419_s3] ss:$0 sm:$0xff]  ;;  %v683_v53 = vld [vmem:[%s1419_s3 + $0x1] ss:$0 sm:$0xff]  ;;  %v684_v54 = vld [vmem:[%s1419_s3 + $0x2] ss:$0 sm:$0xff]  ;;  %p1053_p3 = por %p1052_p13, %p1051_p11 }
  0x78   : > { %812 = vmatprep.subr.bf16.mxu0 %v811_v12 }
  0x79   : > { %p1054_p7 = pnand %p1053_p3, %p1047_p8 }
  0x7a   : > { %838 = vmatpush3.bf16.msra.mxu1 %v835_v31 }
  0x7b   : > { %814 = vmatpush3.bf16.msra.mxu0 %v811_v12  ;;  %840 = vmatprep.subr.bf16.mxu1 %v839_v34 }
  0x7c   : > { %816 = vmatprep.subr.bf16.mxu0 %v815_v15 }
  0x7e   : > { %842 = vmatpush3.bf16.msra.mxu1 %v839_v34  ;;  %v685_v34 = vld [vmem:[%s1421_s5] ss:$0 sm:$0xff] }
  0x7f   : > { %818 = vmatpush3.bf16.msra.mxu0 %v815_v15  ;;  %844 = vmatprep.subr.bf16.mxu1 %v843_v37 }
  0x80   : > { %820 = vmatprep.subr.bf16.mxu0 %v819_v18 }
  0x82   : > { %846 = vmatpush3.bf16.msra.mxu1 %v843_v37 }
  0x83   : > { %822 = vmatpush3.bf16.msra.mxu0 %v819_v18  ;;  %848 = vmatprep.subr.bf16.mxu1 %v847_v40 }
  0x84   : > { %824 = vmatprep.subr.bf16.mxu0 %v823_v21 }
  0x86   : > { %850 = vmatpush3.bf16.msra.mxu1 %v847_v40 }
  0x87   : > { %826 = vmatpush3.bf16.msra.mxu0 %v823_v21  ;;  %852 = vmatprep.subr.bf16.mxu1 %v851_v44 }
  0x88   : > { %828 = vmatprep.subr.bf16.mxu0 %v827_v24 }
  0x8a   : > { %854 = vmatpush3.bf16.msra.mxu1 %v851_v44 }
  0x8b   : > { %830 = vmatpush3.bf16.msra.mxu0 %v827_v24  ;;  %856 = vmatprep.subr.bf16.mxu1 %v855_v46 }
  0x8e   : > { %762 = vmatmul.mubr.f32.vlgmr.msra.gmra.mrb[0].mxu0 %v302_v25  ;;  %858 = vmatpush3.bf16.msra.mxu1 %v855_v46 }
  0x8f   : > { %860 = vmatprep.subr.bf16.mxu1 %v859_v49 }
  0x92   : > { %862 = vmatpush3.bf16.msra.mxu1 %v859_v49 }
 0x161   : > { %v763_v52 = vpop.f32.mrb[0].mxu0 }
 0x162   : > { %v398_v55 = vadd.f32 %v763_v52, %v681_v50  ;;  %v392_v56 = vpop.f32.mrb[1].mxu0 }
 0x163   : > { %v393_v57 = vadd.f32 %v681_v50, %v392_v56 }
 0x164   : > { %v407_v58 = vsub.f32 %v398_v55, %v682_v51  ;;  %v426_v59 = vsub.f32 %v398_v55, %v683_v53  ;;  %v447_v60 = vsub.f32 %v398_v55, %v684_v54 }
 0x165   : > { %v406_v61 = vsub.f32 %v393_v57, %v682_v51  ;;  %v425_v62 = vsub.f32 %v393_v57, %v683_v53  ;;  %v446_v63 = vsub.f32 %v393_v57, %v684_v54 }
 0x166   : > { %v409_v0 = vsub.f32 0.0, %v407_v58  ;;  %v428_v1 = vsub.f32 0.0, %v426_v59  ;;  %v449_v2 = vsub.f32 0.0, %v447_v60 }
 0x167   : > { %v408_v3 = vsub.f32 0.0, %v406_v61  ;;  %v427_v4 = vsub.f32 0.0, %v425_v62  ;;  %v448_v5 = vsub.f32 0.0, %v446_v63 }
 0x168   : > { %v412_v6 = vmul.f32 1.442695, %v409_v0  ;;  %v431_v7 = vmul.f32 1.442695, %v428_v1  ;;  %v452_v8 = vmul.f32 1.442695, %v449_v2 }
 0x169   : > { %v410_v9 = vmul.f32 1.442695, %v408_v3  ;;  %v429_v10 = vmul.f32 1.442695, %v427_v4  ;;  %v450_v11 = vmul.f32 1.442695, %v448_v5 }
 0x16a   : > { %934 = vpow2.f32 %v412_v6 }
 0x16b   : > { %936 = vpow2.f32 %v431_v7 }
 0x16c   : > { %938 = vpow2.f32 %v452_v8 }
 0x16d   : > { %940 = vpow2.f32 %v410_v9 }
 0x16e   : > { %942 = vpow2.f32 %v429_v10 }
 0x16f   : > { %944 = vpow2.f32 %v450_v11 }
 0x174   : > { %v935_v12 = vpop.eup %934 }
 0x175   : > { %v937_v13 = vpop.eup %936  ;;  %v415_v14 = vadd.f32 1.0, %v935_v12 }
 0x176   : > { %v939_v15 = vpop.eup %938  ;;  %v434_v16 = vadd.f32 1.0, %v937_v13 }
 0x177   : > { %v941_v17 = vpop.eup %940  ;;  %946 = vrcp.f32 %v415_v14  ;;  %v455_v22 = vadd.f32 1.0, %v939_v15 }
 0x178   : > { %v943_v18 = vpop.eup %942  ;;  %948 = vrcp.f32 %v434_v16  ;;  %v414_v19 = vadd.f32 1.0, %v941_v17 }
 0x179   : > { %v945_v20 = vpop.eup %944  ;;  %v433_v21 = vadd.f32 1.0, %v943_v18 }
 0x17a   : > { %950 = vrcp.f32 %v414_v19  ;;  %v454_v23 = vadd.f32 1.0, %v945_v20 }
 0x17b   : > { %952 = vrcp.f32 %v433_v21 }
 0x17c   : > { %954 = vrcp.f32 %v454_v23 }
 0x17d   : > { %956 = vrcp.f32 %v455_v22 }
 0x181   : > { %v947_v24 = vpop.eup %946 }
 0x182   : > { %v949_v25 = vpop.eup %948 }
 0x183   : > { %v440_v28 = vmul.f32 %v949_v25, %v947_v24 }
 0x184   : > { %v951_v26 = vpop.eup %950 }
 0x185   : > { %v953_v27 = vpop.eup %952 }
 0x186   : > { %v439_v29 = vmul.f32 %v953_v27, %v951_v26  ;;  %v955_v30 = vpop.eup %954 }
 0x187   : > { %v957_v31 = vpop.eup %956 }
 0x188   : > { %v460_v32 = vmul.f32 %v955_v30, %v439_v29  ;;  %v461_v33 = vmul.f32 %v957_v31, %v440_v28 }
 0x18a   : > { %796 = vmatprep.mubr.f32.mxu1 %v460_v32 }
 0x18b   : > { %797 = vmatmul.mubr.f32.vlgmr.msra.gmra.mrb[0].mxu1 %v461_v33 }
 0x25e   : > { %v798_v35 = vpop.f32.mrb[0].mxu1 }
 0x25f   : > { %v557_v36 = vadd.f32 %v798_v35, %v685_v34  ;;  %v551_v37 = vpop.f32.mrb[1].mxu1 }
 0x260   : > { %v552_v38 = vadd.f32 %v685_v34, %v551_v37 }
 0x261   : > { %561 = vst [vmem:[%s298_s13 + $0x8] sm:$0xff] %v557_v36 }
 0x262   : > { %560 = vst [vmem:[%s298_s13] sm:$0xff] %v552_v38 }
 0x263   : > { %1057 = shalt.err (!%p1054_p7)
}
 0x264   : > { %s1058_s26 = scalar_lea.hbm %s1373_s19, 256  ;;  %s1062_s15 = scalar_lea.hbm %s1422_s6, 768 }
 0x265   : > { %p1059_p9 = scmp.ne.s32.totalorder %s1373_s19, %s1058_s26  ;;  %p1063_p5 = scmp.lt.u32.totalorder %s1373_s19, %s1422_s6 }
 0x266   : > { %p1064_p10 = scmp.lt.u32.totalorder %s1062_s15, %s1058_s26  ;;  %p1066_p2 = scmp.lt.u32.totalorder %s1058_s26, %s1373_s19 }
 0x267   : > { %p1060_p12 = pnand %p1059_p9, %p1277_p6 }
 0x268   : > { %p1065_p1 = por %p1064_p10, %p1063_p5 }
 0x269   : > { %p1061_p0 = pneg %p1060_p12 }
 0x26a   : > { %p1067_p4 = por %p1066_p2, %p1065_p1 }
 0x26c   : > { %p1068_p8 = pnand %p1067_p4, %p1061_p0 }
 0x26e   : > { %1071 = shalt.err (!%p1068_p8)
}
 0x26f   : > { %s1122_s27 = smov 128   ;;  %s1123_s29 = smov 8  }
 0x270   : > { %873 = dma.vmem_to_hbm [thread:$0]  (%p1277_p6), %s1368_s10, 256, %s1373_s19, %s563_s14, %s1122_s27, %s1122_s27, %s1123_s29  }
 0x271 PF: > { %p895_p11 = scmp.ge.s32.totalorder %s1114_s24, 2  ;;  %s591_s20 = sand.u32 1, %s1102_s21  }
 0x272   : > { %p1437_p13 = scmp.ne.s32.totalorder %s1427_s28, 0  ;;  %s592_s25 = scalar_lea.sflag [#allocation4], %s591_s20 }
 0x274   : > { %p887_p3 = pnand %p895_p11, %p1437_p13 }
 0x276   : > { %1097 = dma.done.wait (!%p887_p3), %s592_s25, 256  }
 0x277   : > { %1099 = vsyncadd (!%p887_p3), %s592_s25, 4294967040  ;;  %p20_p7 = scmp.ge.s32.totalorder %s1267_s8, 5   ;;  %s1438_s21 = smov %s1106_s22 }
 0x278   : > { %s1439_s22 = smov %s1110_s23  ;;  %s1440_s23 = smov %s1283_s11 }
 0x279   : > { %s1441_s24 = smov %s1267_s8  ;;  %22 = sbr.rel (!%p20_p7) target bundleno = 6 (0x6), region = 97 }
 0x280   :  { %597 = vsyncpa [#allocation3], 1 }
 0x281   :  { %599 = vsyncpa [#allocation3 + $0x1], 1 }
 0x282   :  { %600 = vsyncpa [#allocation6], 1 }
 0x283   :  { %601 = vsyncpa [#allocation4], 1 }
 0x284   :  { %603 = vsyncpa [#allocation4 + $0x1], 1 }

</bundles_post_ra>
